<compile_context>
chip_gen: v5e
topology: v5e:2x2
jax: 0.10.0
libtpu: 0.0.40
codegen_flags: <defaults>
</compile_context>

<pallas_src>
import functools
import math

import jax
import jax.numpy as jnp
from jax.experimental import pallas as pl
from jax.experimental.pallas import tpu as pltpu


def _round_up(x, m):
    return (x + m - 1) // m * m


def _nbytes(a):
    return a.size * jnp.dtype(a.dtype).itemsize


def _decoder_kernel(x_ref, r_ref,
                    w1x_ref, w1r_ref, b1_ref,
                    w2_ref, b2_ref,
                    w3_ref, b3_ref,
                    out_ref, *, output_dim):
    # x_ref : (TM, Din)        r_ref : (TM, Dlat_in)
    # w1x   : (Din, Dlat)      w1r   : (Dlat_in, Dlat)   (already transposed)
    # w2    : (Dlat, Dlat)     w3    : (Dlat, 2*Dout)    (already transposed)
    # b1/b2 : (1, Dlat) f32    b3    : (1, 2*Dout) f32
    # out   : (TM, 2*Dout) f32; columns [0:Dout] = mean, [Dout:2*Dout] = sigma
    f32 = jnp.float32

    def mdot(a, b):
        # Cast LHS to the weight dtype (supports the bf16 streaming path), accumulate f32.
        return jnp.dot(a.astype(b.dtype), b, preferred_element_type=f32)

    # ---- Layer 1: relu([x | r] @ W1^T + b1), split matmuls instead of a concat ----
    h = mdot(r_ref[...], w1r_ref[...])                      # (TM, Dlat) f32
    din = x_ref.shape[-1]
    if din <= 8:
        # Tiny K: x-contribution via VPU broadcast-multiply-adds (no K=2 MXU chain).
        xf = x_ref[...].astype(f32)
        w1x = w1x_ref[...].astype(f32)
        for d in range(din):                                 # static unroll
            h = h + xf[:, d:d + 1] * w1x[d:d + 1, :]
    else:
        h = h + mdot(x_ref[...], w1x_ref[...])
    h = jnp.maximum(h + b1_ref[...], 0.0)

    # ---- Layer 2: relu(h @ W2^T + b2) ----
    h = jnp.maximum(mdot(h, w2_ref[...]) + b2_ref[...], 0.0)

    # ---- Layer 3: mean and pre-sigma from one matmul ----
    z = mdot(h, w3_ref[...]) + b3_ref[...]                   # (TM, 2*Dout) f32

    # Numerically-stable softplus; sigma transform applied only to columns >= output_dim
    # via a lane-index mask (no lane slicing, single full-width store).
    sp = jnp.maximum(z, 0.0) + jnp.log(1.0 + jnp.exp(-jnp.abs(z)))
    sig = 0.1 + 0.9 * sp
    col = jax.lax.broadcasted_iota(jnp.int32, z.shape, dimension=1)
    out = jnp.where(col >= output_dim, sig, z)

    out_ref[...] = out.astype(out_ref.dtype)


def deterministic_decoder(x, r, params, *, output_dim, weight_dtype=None):
    """x: (..., num_targets, input_dim), r: (..., num_targets, latent_dim).

    Returns (mean, sigma), each of shape (..., num_targets, output_dim).
    weight_dtype: optional (e.g. jnp.bfloat16) to stream r + weights at half width
    on bf16-native MXUs (v6e/v7x); accumulation and post-matmul math stay f32.
    """
    # Mirror the torch branch: if x has fewer dims than r, broadcast x over r's
    # leading (sample) dimension.  (Assumes exactly one extra leading dim, like torch.)
    if x.ndim != r.ndim:
        x = jnp.broadcast_to(x[None], (r.shape[0],) + x.shape)
    assert x.shape[:-1] == r.shape[:-1], "x and r must share leading dims"

    lead = x.shape[:-1]
    Din = x.shape[-1]
    Dlat_in = r.shape[-1]
    M = math.prod(lead)

    x2 = x.reshape(M, Din).astype(jnp.float32)
    r2 = r.reshape(M, Dlat_in)

    w1, b1 = params["w1"], params["b1"]          # (Dlat, Din+Dlat_in), (Dlat,)
    w2, b2 = params["w2"], params["b2"]          # (Dlat, Dlat),        (Dlat,)
    w3, b3 = params["w3"], params["b3"]          # (2*Dout, Dlat),      (2*Dout,)
    Dlat = w1.shape[0]
    Dout2 = 2 * output_dim

    # Pre-transpose weights (free layout plumbing) and split W1 into x / r column blocks
    # so the kernel never concatenates along the lane axis.
    w1x_t = jnp.asarray(w1[:, :Din].T, dtype=jnp.float32)    # (Din, Dlat)
    w1r_t = jnp.asarray(w1[:, Din:].T, dtype=jnp.float32)    # (Dlat_in, Dlat)
    w2_t = jnp.asarray(w2.T, dtype=jnp.float32)              # (Dlat, Dlat)
    w3_t = jnp.asarray(w3.T, dtype=jnp.float32)              # (Dlat, 2*Dout)
    if weight_dtype is not None:
        r2 = r2.astype(weight_dtype)
        w1x_t = w1x_t.astype(weight_dtype)
        w1r_t = w1r_t.astype(weight_dtype)
        w2_t = w2_t.astype(weight_dtype)
        w3_t = w3_t.astype(weight_dtype)
    b1_2 = b1.reshape(1, Dlat).astype(jnp.float32)
    b2_2 = b2.reshape(1, Dlat).astype(jnp.float32)
    b3_2 = b3.reshape(1, Dout2).astype(jnp.float32)

    # ---- Row-tile selection: big tiles, no wrapper pad, >=2 steps when feasible ----
    TM_TARGET = 2048                              # ~150 B/row -> well under VMEM even x2 buffers
    M8 = _round_up(max(M, 1), 8)
    if M8 >= 2 * TM_TARGET:
        TM = TM_TARGET
    elif M8 >= 16:
        # Modest M: split into two row tiles so both v7x TensorCores get work.
        TM = _round_up(pl.cdiv(M8, 2), 8)
    else:
        TM = M8
    grid = (pl.cdiv(M, TM),)                      # ragged tail block masked by Pallas

    # ---- VMEM budget (double-buffered tiles + resident weights) ----
    row_bytes = (Din * 4
                 + Dlat_in * jnp.dtype(r2.dtype).itemsize
                 + Dout2 * 4)
    weight_bytes = sum(_nbytes(a) for a in
                       (w1x_t, w1r_t, b1_2, w2_t, b2_2, w3_t, b3_2))
    vmem_need = 2 * TM * row_bytes + 2 * weight_bytes + (1 << 20)
    # Floor above v5e's 16 MiB default scoped limit; cap with headroom under
    # v7x's 64 MiB physical VMEM.
    vmem_limit = int(min(max(vmem_need, 16 << 20), 48 << 20))

    # ---- Cost estimate so XLA overlaps this small kernel with surrounding ops ----
    flops = 2 * M * ((Din + Dlat_in) * Dlat + Dlat * Dlat + Dlat * Dout2)
    transcendentals = 2 * M * Dout2
    bytes_accessed = (_nbytes(x2) + _nbytes(r2) + weight_bytes + M * Dout2 * 4)

    kernel = functools.partial(_decoder_kernel, output_dim=output_dim)

    grid_spec = pl.GridSpec(
        grid=grid,
        in_specs=[
            pl.BlockSpec((TM, Din), lambda i: (i, 0)),        # x rows
            pl.BlockSpec((TM, Dlat_in), lambda i: (i, 0)),    # r rows
            pl.BlockSpec((Din, Dlat), lambda i: (0, 0)),      # W1x^T
            pl.BlockSpec((Dlat_in, Dlat), lambda i: (0, 0)),  # W1r^T
            pl.BlockSpec((1, Dlat), lambda i: (0, 0)),        # b1
            pl.BlockSpec((Dlat, Dlat), lambda i: (0, 0)),     # W2^T
            pl.BlockSpec((1, Dlat), lambda i: (0, 0)),        # b2
            pl.BlockSpec((Dlat, Dout2), lambda i: (0, 0)),    # W3^T
            pl.BlockSpec((1, Dout2), lambda i: (0, 0)),       # b3
        ],
        out_specs=pl.BlockSpec((TM, Dout2), lambda i: (i, 0)),
    )

    out = pl.pallas_call(
        kernel,
        out_shape=jax.ShapeDtypeStruct((M, Dout2), jnp.float32),
        grid_spec=grid_spec,
        compiler_params=pltpu.CompilerParams(
            dimension_semantics=("parallel",),
            vmem_limit_bytes=vmem_limit),
        cost_estimate=pl.CostEstimate(
            flops=int(flops),
            transcendentals=int(transcendentals),
            bytes_accessed=int(bytes_accessed)),
    )(x2, r2, w1x_t, w1r_t, b1_2, w2_t, b2_2, w3_t, b3_2)

    mean = out[:, :output_dim].reshape(*lead, output_dim)
    sigma = out[:, output_dim:].reshape(*lead, output_dim)
    return mean, sigma


def _reference_decoder(x, r, params, *, output_dim):
    """Pure-JAX mirror of the PyTorch forward (for sanity checking)."""
    if x.ndim != r.ndim:
        x = jnp.broadcast_to(x[None], (r.shape[0],) + x.shape)
    z = jnp.concatenate([x, r], axis=-1)
    h = jax.nn.relu(z @ params["w1"].T + params["b1"])
    h = jax.nn.relu(h @ params["w2"].T + params["b2"])
    z = h @ params["w3"].T + params["b3"]
    mean = z[..., :output_dim]
    sigma = 0.1 + 0.9 * jax.nn.softplus(z[..., output_dim:])
    return mean, sigma


if __name__ == "__main__":
    # Small shapes consistent with the module's forward.
    B = 2              # batch (tasks)
    N = 8              # num_targets
    input_dim = 2
    latent_dim = 32
    output_dim = 2

    key = jax.random.PRNGKey(0)
    k_x, k_r, k_w1, k_b1, k_w2, k_b2, k_w3, k_b3, k_x2, k_r2 = jax.random.split(key, 10)

    x = jax.random.normal(k_x, (B, N, input_dim), dtype=jnp.float32)
    r = jax.random.normal(k_r, (B, N, latent_dim), dtype=jnp.float32)

    # nn.Linear weight layout: (out_features, in_features).
    params = {
        "w1": 0.1 * jax.random.normal(k_w1, (latent_dim, latent_dim + input_dim), jnp.float32),
        "b1": 0.1 * jax.random.normal(k_b1, (latent_dim,), jnp.float32),
        "w2": 0.1 * jax.random.normal(k_w2, (latent_dim, latent_dim), jnp.float32),
        "b2": 0.1 * jax.random.normal(k_b2, (latent_dim,), jnp.float32),
        "w3": 0.1 * jax.random.normal(k_w3, (2 * output_dim, latent_dim), jnp.float32),
        "b3": 0.1 * jax.random.normal(k_b3, (2 * output_dim,), jnp.float32),
    }

    # --- f32 path (default) ---
    mean, sigma = deterministic_decoder(x, r, params, output_dim=output_dim)
    mean = jax.block_until_ready(mean)
    sigma = jax.block_until_ready(sigma)

    ref_mean, ref_sigma = _reference_decoder(x, r, params, output_dim=output_dim)
    assert mean.shape == (B, N, output_dim)
    assert sigma.shape == (B, N, output_dim)
    assert jnp.allclose(mean, ref_mean, atol=1e-5, rtol=1e-5), "mean mismatch vs reference"
    assert jnp.allclose(sigma, ref_sigma, atol=1e-5, rtol=1e-5), "sigma mismatch vs reference"
    assert bool(jnp.all(sigma > 0.0)), "sigma must be positive"

    # --- ragged row count (M not a multiple of the tile / of 8): exercises the
    #     no-pad tail-masking path with a 2-step grid ---
    N2 = 37
    x_b = jax.random.normal(k_x2, (B, N2, input_dim), dtype=jnp.float32)
    r_b = jax.random.normal(k_r2, (B, N2, latent_dim), dtype=jnp.float32)
    mean_b, sigma_b = deterministic_decoder(x_b, r_b, params, output_dim=output_dim)
    mean_b = jax.block_until_ready(mean_b)
    sigma_b = jax.block_until_ready(sigma_b)
    ref_mean_b, ref_sigma_b = _reference_decoder(x_b, r_b, params, output_dim=output_dim)
    assert jnp.allclose(mean_b, ref_mean_b, atol=1e-5, rtol=1e-5), "ragged mean mismatch"
    assert jnp.allclose(sigma_b, ref_sigma_b, atol=1e-5, rtol=1e-5), "ragged sigma mismatch"

    # --- bf16 streaming path (v6e/v7x friendly): looser tolerance vs f32 reference ---
    mean_h, sigma_h = deterministic_decoder(
        x, r, params, output_dim=output_dim, weight_dtype=jnp.bfloat16)
    mean_h = jax.block_until_ready(mean_h)
    sigma_h = jax.block_until_ready(sigma_h)
    assert jnp.allclose(mean_h, ref_mean, atol=5e-2, rtol=5e-2), "bf16 mean mismatch"
    assert jnp.allclose(sigma_h, ref_sigma, atol=5e-2, rtol=5e-2), "bf16 sigma mismatch"

    print("KERNEL_OK")
</pallas_src>

<mosaic_0001>
module attributes {stable_mosaic.version = 11 : i64} {
  func.func @_decoder_kernel(%arg0: i32, %arg1: memref<8x2xf32, #tpu.memory_space<vmem>>, %arg2: memref<8x32xf32, #tpu.memory_space<vmem>>, %arg3: memref<2x32xf32, #tpu.memory_space<vmem>>, %arg4: memref<32x32xf32, #tpu.memory_space<vmem>>, %arg5: memref<1x32xf32, #tpu.memory_space<vmem>>, %arg6: memref<32x32xf32, #tpu.memory_space<vmem>>, %arg7: memref<1x32xf32, #tpu.memory_space<vmem>>, %arg8: memref<32x4xf32, #tpu.memory_space<vmem>>, %arg9: memref<1x4xf32, #tpu.memory_space<vmem>>, %arg10: memref<8x4xf32, #tpu.memory_space<vmem>>) attributes {dimension_semantics = [#tpu.dimension_semantics<parallel>], iteration_bounds = array<i64: 2>, scalar_prefetch = 0 : i64, scratch_operands = 0 : i64, tpu.core_type = #tpu.core_type<tc>, window_params = [{transform_indices = @transform_0, window_bounds = array<i64: 8, 2>}, {transform_indices = @transform_1, window_bounds = array<i64: 8, 32>}, {pipeline_mode = #tpu.pipeline_mode<synchronous>, transform_indices = @transform_2, window_bounds = array<i64: 2, 32>}, {pipeline_mode = #tpu.pipeline_mode<synchronous>, transform_indices = @transform_3, window_bounds = array<i64: 32, 32>}, {pipeline_mode = #tpu.pipeline_mode<synchronous>, transform_indices = @transform_4, window_bounds = array<i64: 1, 32>}, {pipeline_mode = #tpu.pipeline_mode<synchronous>, transform_indices = @transform_5, window_bounds = array<i64: 32, 32>}, {pipeline_mode = #tpu.pipeline_mode<synchronous>, transform_indices = @transform_6, window_bounds = array<i64: 1, 32>}, {pipeline_mode = #tpu.pipeline_mode<synchronous>, transform_indices = @transform_7, window_bounds = array<i64: 32, 4>}, {pipeline_mode = #tpu.pipeline_mode<synchronous>, transform_indices = @transform_8, window_bounds = array<i64: 1, 4>}, {transform_indices = @transform_9, window_bounds = array<i64: 8, 4>}]} {
    %c0 = arith.constant 0 : index
    %c0_0 = arith.constant 0 : index
    %0 = vector.load %arg2[%c0, %c0_0] : memref<8x32xf32, #tpu.memory_space<vmem>>, vector<8x32xf32>
    %c0_1 = arith.constant 0 : index
    %c0_2 = arith.constant 0 : index
    %1 = vector.load %arg4[%c0_1, %c0_2] : memref<32x32xf32, #tpu.memory_space<vmem>>, vector<32x32xf32>
    %cst = arith.constant dense<0.000000e+00> : vector<8x32xf32>
    %2 = tpu.matmul %0, %1, %cst {dimension_numbers = #tpu.dot_dimension_numbers<[1], [0], [0], [1], [0, 0, 1, 1], [], []>} : vector<8x32xf32>, vector<32x32xf32>, vector<8x32xf32> -> vector<8x32xf32>
    %c0_3 = arith.constant 0 : index
    %c0_4 = arith.constant 0 : index
    %3 = vector.load %arg1[%c0_3, %c0_4] : memref<8x2xf32, #tpu.memory_space<vmem>>, vector<8x2xf32>
    %c0_5 = arith.constant 0 : index
    %c0_6 = arith.constant 0 : index
    %4 = vector.load %arg3[%c0_5, %c0_6] : memref<2x32xf32, #tpu.memory_space<vmem>>, vector<2x32xf32>
    %5 = vector.extract_strided_slice %3 {offsets = [0, 0], sizes = [8, 1], strides = [1, 1]} : vector<8x2xf32> to vector<8x1xf32>
    %6 = vector.extract_strided_slice %4 {offsets = [0, 0], sizes = [1, 32], strides = [1, 1]} : vector<2x32xf32> to vector<1x32xf32>
    %7 = vector.broadcast %5 : vector<8x1xf32> to vector<8x32xf32>
    %8 = vector.broadcast %6 : vector<1x32xf32> to vector<8x32xf32>
    %9 = arith.mulf %7, %8 : vector<8x32xf32>
    %10 = arith.addf %2, %9 : vector<8x32xf32>
    %11 = vector.extract_strided_slice %3 {offsets = [0, 1], sizes = [8, 1], strides = [1, 1]} : vector<8x2xf32> to vector<8x1xf32>
    %12 = vector.extract_strided_slice %4 {offsets = [1, 0], sizes = [1, 32], strides = [1, 1]} : vector<2x32xf32> to vector<1x32xf32>
    %13 = vector.broadcast %11 : vector<8x1xf32> to vector<8x32xf32>
    %14 = vector.broadcast %12 : vector<1x32xf32> to vector<8x32xf32>
    %15 = arith.mulf %13, %14 : vector<8x32xf32>
    %16 = arith.addf %10, %15 : vector<8x32xf32>
    %c0_7 = arith.constant 0 : index
    %c0_8 = arith.constant 0 : index
    %17 = vector.load %arg5[%c0_7, %c0_8] : memref<1x32xf32, #tpu.memory_space<vmem>>, vector<1x32xf32>
    %18 = vector.broadcast %17 : vector<1x32xf32> to vector<8x32xf32>
    %19 = arith.addf %16, %18 : vector<8x32xf32>
    %cst_9 = arith.constant 0.000000e+00 : f32
    %20 = vector.broadcast %cst_9 : f32 to vector<8x32xf32>
    %21 = arith.maximumf %19, %20 : vector<8x32xf32>
    %c0_10 = arith.constant 0 : index
    %c0_11 = arith.constant 0 : index
    %22 = vector.load %arg6[%c0_10, %c0_11] : memref<32x32xf32, #tpu.memory_space<vmem>>, vector<32x32xf32>
    %cst_12 = arith.constant dense<0.000000e+00> : vector<8x32xf32>
    %23 = tpu.matmul %21, %22, %cst_12 {dimension_numbers = #tpu.dot_dimension_numbers<[1], [0], [0], [1], [0, 0, 1, 1], [], []>} : vector<8x32xf32>, vector<32x32xf32>, vector<8x32xf32> -> vector<8x32xf32>
    %c0_13 = arith.constant 0 : index
    %c0_14 = arith.constant 0 : index
    %24 = vector.load %arg7[%c0_13, %c0_14] : memref<1x32xf32, #tpu.memory_space<vmem>>, vector<1x32xf32>
    %25 = vector.broadcast %24 : vector<1x32xf32> to vector<8x32xf32>
    %26 = arith.addf %23, %25 : vector<8x32xf32>
    %cst_15 = arith.constant 0.000000e+00 : f32
    %27 = vector.broadcast %cst_15 : f32 to vector<8x32xf32>
    %28 = arith.maximumf %26, %27 : vector<8x32xf32>
    %c0_16 = arith.constant 0 : index
    %c0_17 = arith.constant 0 : index
    %29 = vector.load %arg8[%c0_16, %c0_17] : memref<32x4xf32, #tpu.memory_space<vmem>>, vector<32x4xf32>
    %cst_18 = arith.constant dense<0.000000e+00> : vector<8x4xf32>
    %30 = tpu.matmul %28, %29, %cst_18 {dimension_numbers = #tpu.dot_dimension_numbers<[1], [0], [0], [1], [0, 0, 1, 1], [], []>} : vector<8x32xf32>, vector<32x4xf32>, vector<8x4xf32> -> vector<8x4xf32>
    %c0_19 = arith.constant 0 : index
    %c0_20 = arith.constant 0 : index
    %31 = vector.load %arg9[%c0_19, %c0_20] : memref<1x4xf32, #tpu.memory_space<vmem>>, vector<1x4xf32>
    %32 = vector.broadcast %31 : vector<1x4xf32> to vector<8x4xf32>
    %33 = arith.addf %30, %32 : vector<8x4xf32>
    %cst_21 = arith.constant 0.000000e+00 : f32
    %34 = vector.broadcast %cst_21 : f32 to vector<8x4xf32>
    %35 = arith.maximumf %33, %34 : vector<8x4xf32>
    %36 = math.absf %33 : vector<8x4xf32>
    %cst_22 = arith.constant 0.000000e+00 : f32
    %37 = vector.broadcast %cst_22 : f32 to vector<8x4xf32>
    %38 = arith.subf %37, %36 : vector<8x4xf32>
    %39 = math.exp %38 : vector<8x4xf32>
    %cst_23 = arith.constant 1.000000e+00 : f32
    %40 = vector.broadcast %cst_23 : f32 to vector<8x4xf32>
    %41 = arith.addf %40, %39 : vector<8x4xf32>
    %42 = math.log %41 : vector<8x4xf32>
    %43 = arith.addf %35, %42 : vector<8x4xf32>
    %cst_24 = arith.constant 0.899999976 : f32
    %44 = vector.broadcast %cst_24 : f32 to vector<8x4xf32>
    %45 = arith.mulf %44, %43 : vector<8x4xf32>
    %cst_25 = arith.constant 1.000000e-01 : f32
    %46 = vector.broadcast %cst_25 : f32 to vector<8x4xf32>
    %47 = arith.addf %46, %45 : vector<8x4xf32>
    %48 = tpu.iota {dimensions = array<i32: 1>} : vector<8x4xi32>
    %c2_i32 = arith.constant 2 : i32
    %49 = vector.broadcast %c2_i32 : i32 to vector<8x4xi32>
    %50 = arith.cmpi sge, %48, %49 : vector<8x4xi32>
    %51 = arith.select %50, %47, %33 : vector<8x4xi1>, vector<8x4xf32>
    %c0_26 = arith.constant 0 : index
    %c0_27 = arith.constant 0 : index
    %52 = vector.load %arg10[%c0_26, %c0_27] : memref<8x4xf32, #tpu.memory_space<vmem>>, vector<8x4xf32>
    tpu.vector_store %arg10[%c0_26, %c0_27], %51 {strides = array<i32>} : memref<8x4xf32, #tpu.memory_space<vmem>>, vector<8x4xf32>,
    return
  }
  func.func @transform_0(%arg0: i32) -> (i32, i32) {
    %c0_i32 = arith.constant 0 : i32
    %c0_i32_0 = arith.constant 0 : i32
    return %arg0, %c0_i32 : i32, i32
  }
  func.func @transform_1(%arg0: i32) -> (i32, i32) {
    %c0_i32 = arith.constant 0 : i32
    %c0_i32_0 = arith.constant 0 : i32
    return %arg0, %c0_i32 : i32, i32
  }
  func.func @transform_2(%arg0: i32) -> (i32, i32) {
    %c0_i32 = arith.constant 0 : i32
    %c0_i32_0 = arith.constant 0 : i32
    %c0_i32_1 = arith.constant 0 : i32
    return %c0_i32, %c0_i32_0 : i32, i32
  }
  func.func @transform_3(%arg0: i32) -> (i32, i32) {
    %c0_i32 = arith.constant 0 : i32
    %c0_i32_0 = arith.constant 0 : i32
    %c0_i32_1 = arith.constant 0 : i32
    return %c0_i32, %c0_i32_0 : i32, i32
  }
  func.func @transform_4(%arg0: i32) -> (i32, i32) {
    %c0_i32 = arith.constant 0 : i32
    %c0_i32_0 = arith.constant 0 : i32
    %c0_i32_1 = arith.constant 0 : i32
    return %c0_i32, %c0_i32_0 : i32, i32
  }
  func.func @transform_5(%arg0: i32) -> (i32, i32) {
    %c0_i32 = arith.constant 0 : i32
    %c0_i32_0 = arith.constant 0 : i32
    %c0_i32_1 = arith.constant 0 : i32
    return %c0_i32, %c0_i32_0 : i32, i32
  }
  func.func @transform_6(%arg0: i32) -> (i32, i32) {
    %c0_i32 = arith.constant 0 : i32
    %c0_i32_0 = arith.constant 0 : i32
    %c0_i32_1 = arith.constant 0 : i32
    return %c0_i32, %c0_i32_0 : i32, i32
  }
  func.func @transform_7(%arg0: i32) -> (i32, i32) {
    %c0_i32 = arith.constant 0 : i32
    %c0_i32_0 = arith.constant 0 : i32
    %c0_i32_1 = arith.constant 0 : i32
    return %c0_i32, %c0_i32_0 : i32, i32
  }
  func.func @transform_8(%arg0: i32) -> (i32, i32) {
    %c0_i32 = arith.constant 0 : i32
    %c0_i32_0 = arith.constant 0 : i32
    %c0_i32_1 = arith.constant 0 : i32
    return %c0_i32, %c0_i32_0 : i32, i32
  }
  func.func @transform_9(%arg0: i32) -> (i32, i32) {
    %c0_i32 = arith.constant 0 : i32
    %c0_i32_0 = arith.constant 0 : i32
    return %arg0, %c0_i32 : i32, i32
  }
}

</mosaic_0001>

<bundles_post_ra>
// kernel: tpu_custom_call.1
= control target key start
LH: loop header
LB: loop body
LE: loop exit
PB: predicated region body
PF: predicated region fallthrough
CT: control target
= control target key end

     0   :  { %14 = vsyncpa [#allocation3], 0  ;;  %s714_s30 = smov 0   ;;  %s781_s0 = inlined_call_operand.vmem [shape: f32[16,2], index: 0, kind: input, shape index: {}]   ;;  %s782_s1 = inlined_call_operand.vmem [shape: f32[16,32], index: 1, kind: input, shape index: {}]   ;;  %s783_s2 = inlined_call_operand.vmem [shape: f32[2,32], index: 2, kind: input, shape index: {}]   ;;  %s784_s3 = inlined_call_operand.vmem [shape: f32[32,32], index: 3, kind: input, shape index: {}]   ;;  %s785_s4 = inlined_call_operand.vmem [shape: f32[1,32], index: 4, kind: input, shape index: {}]   ;;  %s786_s5 = inlined_call_operand.hbm [shape: f32[32,32], index: 5, kind: input, shape index: {}]   ;;  %s787_s6 = inlined_call_operand.vmem [shape: f32[1,32], index: 6, kind: input, shape index: {}]   ;;  %s788_s7 = inlined_call_operand.vmem [shape: f32[32,4], index: 7, kind: input, shape index: {}]   ;;  %s789_s8 = inlined_call_operand.vmem [shape: f32[1,4], index: 8, kind: input, shape index: {}]   ;;  %s790_s9 = inlined_call_operand.vmem [shape: f32[16,4], index: 9, kind: output, shape index: {}]  }
   0x1 LB: > { %s270_s12 = sshll.u32 %s786_s5, 4  ;;  %s570_s13 = sadd.s32 4294967295, %s657_s30   ;;  %s657_s30 = sphi %s714_s30, %s20_s30   ;;  %s271_s12 = int_to_ptr.hbm [resolvable:$true] %s270_s12 }
   0x2   : > { %p572_p0 = scmp.ge.s32.totalorder %s657_s30, 1  ;;  %p250_p1 = scmp.lt.s32.totalorder %s657_s30, 3 }
   0x3   : > { %p593_p2 = scmp.eq.s32.totalorder %s570_s13, 0  ;;  %s659_s14 = smov [#allocation2]  }
   0x4   : > { %p251_p3 = pnand %p572_p0, %p250_p1  ;;  %s272_s15 = sshll.u32 %s659_s14, 4  ;;  %s273_s15 = int_to_ptr.vmem [resolvable:$true] %s272_s15 }
   0x5   : > { %s660_s16 = smov 128   ;;  %s661_s17 = smov 8  }
   0x6   : > { %p589_p4 = pneg %p251_p3  ;;  %311 = sbr.rel (%p251_p3) target bundleno = 450 (0x1c2), region = 56 }
   0x8   : > { %p590_p5 = pnand %p593_p2, %p589_p4 }
   0xa   : > { %592 = dma.hbm_to_vmem [thread:$0]  (!%p590_p5), %s271_s12, 512, %s273_s15, [#allocation3], %s660_s16, %s660_s16, %s661_s17  }
   0xb   : > { %652 = dma.done.wait (%p593_p2), [#allocation3], 512  }
   0xc   : > { %654 = vsyncadd (%p593_p2), [#allocation3], 4294966784  ;;  %p350_p6 = scmp.lt.s32.totalorder %s570_s13, 1  ;;  %v662_v0 = vmov 0   ;;  %v366_v1 = vld [vmem:[%s784_s3 + $0x18] sm:$0xff]  ;;  %v365_v2 = vld [vmem:[%s784_s3 + $0x10] sm:$0xff]  ;;  %v487_v41 = vlaneseq }
   0xd   : > { %608 = vset.pattern.permute.xlu0 %v662_v0  ;;  %392 = vmatpush.msra.mxu0 %v366_v1  ;;  %v364_v4 = vld [vmem:[%s784_s3 + $0x8] sm:$0xff]  ;;  %v363_v5 = vld [vmem:[%s784_s3] sm:$0xff]  ;;  %vm376_vm0 = vcmask 261120   ;;  %v663_v7 = vmov 1   ;;  %v416_v8 = vld [vmem:[#allocation2 + $0x18] sm:$0xff]  ;;  %vm491_vm2 = vcmask 31744  }
   0xe   : > { %s792_s13 = smov (!%p350_p6, %s570_s13), 1  ;;  %436 = vmatpush.msra.mxu1 %v416_v8  ;;  %v415_v9 = vld [vmem:[#allocation2 + $0x10] sm:$0xff]  ;;  %v414_v10 = vld [vmem:[#allocation2 + $0x8] sm:$0xff]  ;;  %v413_v11 = vld [vmem:[#allocation2] sm:$0xff]  ;;  %v488_v45 = vand.u32 127, %v487_v41 }
   0xf   : > { %s725_s18 = sshll.u32 %s792_s13, 3  ;;  %393 = vmatpush.msra.mxu0 %v365_v2  ;;  %v448_v12 = vld [vmem:[%s788_s7 + $0x18] sm:$0xff]  ;;  %v368_v14 = vld [vmem:[%s783_s2] sm:$0x3]  ;;  %v447_v26 = vld [vmem:[%s788_s7 + $0x10] sm:$0xff] }
  0x10   : > { %s353_s21 = scalar_lea.vmem %s781_s0, %s725_s18  ;;  %s357_s10 = scalar_lea.vmem %s782_s1, %s725_s18  ;;  %437 = vmatpush.msra.mxu1 %v415_v9  ;;  %468 = vmatpush.msra.mxu2 %v448_v12  ;;  %v374_v15 = vperm.slane %v368_v14, 0  ;;  %v404_v16 = vperm.slane %v368_v14, 1  ;;  %v610_v22 = vld [vmem:[%s785_s4] ss:$0 sm:$0xff]  ;;  %v446_v27 = vld [vmem:[%s788_s7 + $0x8] sm:$0xff]  ;;  %vm489_vm1 = vcmp.ge.s32.totalorder %v488_v45, 2 }
  0x11   : > { %v367_v3 = vld [vmem:[%s353_s21] sm:$0xff]  ;;  %394 = vmatpush.msra.mxu0 %v364_v4  ;;  %s361_s12 = scalar_lea.vmem %s790_s9, %s725_s18 }
  0x12   : > { %371 = vperm.xlu0 %608, %v367_v3   ;;  %v362_v6 = vld [vmem:[%s357_s10] sm:$0xff]  ;;  %438 = vmatpush.msra.mxu1 %v414_v10 }
  0x13   : > { %395 = vmatpush.msra.mxu0 %v363_v5  ;;  %469 = vmatpush.msra.mxu2 %v447_v26  ;;  %v445_v28 = vld [vmem:[%s788_s7] sm:$0xff] }
  0x14   : > { %580 = vmatmul.msk.f32.vlgmr.msra.gmra.mxu0 %vm376_vm0, %v362_v6  ;;  %439 = vmatpush.msra.mxu1 %v413_v11  ;;  %v611_v29 = vld [vmem:[%s787_s6] ss:$0 sm:$0xff] }
  0x15   : > { %470 = vmatpush.msra.mxu2 %v446_v27  ;;  %v612_v33 = vld [vmem:[%s789_s8] ss:$0 sm:$0xff] }
  0x17   : > { %471 = vmatpush.msra.mxu2 %v445_v28 }
  0x1a   : > { %609 = vset.pattern.permute.xlu0 %v663_v7 }
  0x1b   : > { %401 = vperm.xlu0 %609, %v367_v3  }
  0x84   : > { %v372_v13 = vpop.permute.xlu0 %371 }
  0x85   : > { %v375_v18 = vmul.f32 %v374_v15, %v372_v13 }
  0x8d   : > { %v402_v17 = vpop.permute.xlu0 %401 }
  0x8e   : > { %v405_v19 = vmul.f32 %v404_v16, %v402_v17 }
  0x91   : > { %v397_v20 = vpop.f32.mrf.mxu0 }
  0x92   : > { %v398_v21 = vadd.f32 %v397_v20, %v375_v18 }
  0x94   : > { %v406_v23 = vadd.f32 %v405_v19, %v398_v21 }
  0x96   : > { %v411_v24 = vadd.f32 %v610_v22, %v406_v23 }
  0x98   : > { %v412_v25 = vmax.f32 %v411_v24, 0.0 }
  0x9a   : > { %581 = vmatmul.msk.f32.vlgmr.msra.gmra.mxu1 %vm376_vm0, %v412_v25 }
 0x117   : > { %v441_v30 = vpop.f32.mrf.mxu1 }
 0x118   : > { %v442_v31 = vadd.f32 %v611_v29, %v441_v30 }
 0x11a   : > { %v444_v32 = vmax.f32 %v442_v31, 0.0 }
 0x11c   : > { %582 = vmatmul.msk.f32.vlgmr.msra.gmra.mxu2 %vm376_vm0, %v444_v32 }
 0x19f   : > { %v473_v34 = vpop.f32.mrf.mxu2 }
 0x1a0   : > { %v474_v35 = vadd.f32 %v612_v33, %v473_v34 }
 0x1a2   : > { %v477_v36 = vand.u32 2147483647, %v474_v35  ;;  %v476_v43 = vmax.f32 %v474_v35, 0.0 }
 0x1a4   : > { %v478_v37 = vsub.f32 0.0, %v477_v36 }
 0x1a6   : > { %v479_v38 = vmul.f32 1.442695, %v478_v37 }
 0x1a8   : > { %613 = vpow2.f32 %v479_v38 }
 0x1ae   : > { %v614_v39 = vpop.eup %613 }
 0x1af   : > { %v481_v40 = vadd.f32 1.0, %v614_v39 }
 0x1b1   : > { %615 = vlog2.f32 %v481_v40 }
 0x1b7   : > { %v616_v42 = vpop.eup %615 }
 0x1b8   : > { %v483_v44 = vmul.f32 0.6931472, %v616_v42 }
 0x1ba   : > { %v484_v46 = vadd.f32 %v483_v44, %v476_v43 }
 0x1bc   : > { %v485_v47 = vmul.f32 0.9, %v484_v46 }
 0x1be   : > { %v486_v48 = vadd.f32 0.1, %v485_v47 }
 0x1c0   : > { %v490_v49 = vsel %vm489_vm1, %v486_v48, %v474_v35 }
 0x1c1   : > { %492 = vst.msk [vmem:[%s361_s12] sm:$0xff] %vm491_vm2, %v490_v49 }
 0x1c2 PF: > { %s20_s30 = sadd.s32 1, %s657_s30  }
 0x1c3   : > { %p17_p7 = scmp.ge.s32.totalorder %s20_s30, 4  }
 0x1c5   :  { %19 = sbr.rel (!%p17_p7) target bundleno = 1 (0x1), region = 94 }
 0x1ca   :  { %512 = vsyncpa [#allocation3], 1 }
 0x1cb   :  { %514 = vsyncpa [#allocation3 + $0x1], 1 }

</bundles_post_ra>
